<compile_context>
chip_gen: v7x
topology: tpu7x:2x2x1
jax: 0.10.0
libtpu: 0.0.40
codegen_flags: <defaults>
</compile_context>

<pallas_src>
import jax
import jax.numpy as jnp
from jax import lax
from jax.experimental import pallas as pl
from jax.experimental.pallas import tpu as pltpu

NUM_KERNELS = 3   # linear, rbf, cosine
_LANE = 128       # TPU lane width
_MAX_TILE = 512   # (3, 512, 512) f32 = 3 MiB block -> 6 MiB double-buffered (v7x-safe)


def _combined_kernels_kernel(params_ref, xi_ref, xj_ref, sqn_i_ref, sqn_j_ref, out_ref):
    # params_ref : SMEM (4,)  [lin_scale, rbf_outputscale, 0.5/lengthscale^2, cos_scale]
    # xi_ref     : VMEM (TM, D)   row tile of x
    # xj_ref     : VMEM (TN, D)   column tile of x
    # sqn_i_ref  : VMEM (TM, 1)   row squared norms
    # sqn_j_ref  : VMEM (1, TN)   column squared norms (already lane-dense)
    # out_ref    : VMEM (3, TM, TN)
    lin_scale = params_ref[0]
    rbf_outputscale = params_ref[1]
    inv_two_ls2 = params_ref[2]          # precomputed 0.5 / lengthscale^2
    cos_scale = params_ref[3]

    xi = xi_ref[...]
    xj = xj_ref[...]

    # Shared Gram tile on the MXU; contract the lane-dense feature dim of both
    # operands directly (no explicit transpose through the XLU / extra VMEM tile).
    gram = lax.dot_general(
        xi, xj,
        dimension_numbers=(((1,), (1,)), ((), ())),
        preferred_element_type=jnp.float32,
    )  # (TM, TN)

    sqn_i = sqn_i_ref[...]               # (TM, 1)
    sqn_j = sqn_j_ref[...]               # (1, TN)

    # Kernel 0: linear.
    out_ref[0] = (lin_scale * gram).astype(out_ref.dtype)

    # Kernel 1: RBF (squared distances via norms + Gram; clamp cancellation).
    d2 = jnp.maximum(sqn_i + sqn_j - 2.0 * gram, 0.0)
    out_ref[1] = (rbf_outputscale * jnp.exp(-d2 * inv_two_ls2)).astype(out_ref.dtype)

    # Kernel 2: cosine similarity (rsqrt runs on the EUP slot, effectively free).
    inv_i = lax.rsqrt(sqn_i + 1e-12)
    inv_j = lax.rsqrt(sqn_j + 1e-12)
    out_ref[2] = (cos_scale * gram * inv_i * inv_j).astype(out_ref.dtype)


def _pick_tile(n_pad):
    for t in (_MAX_TILE, 256, _LANE):
        if n_pad % t == 0:
            return t
    return _LANE


def combined_kernels_forward(x, params):
    """x: (N, D) float32, params: (4,) = [lin_s, rbf_out, rbf_len, cos_s] -> (3, N, N) f32."""
    x = x.astype(jnp.float32)
    N, D = x.shape

    # Pad N to a multiple of 128 so output stores are full-lane (unmasked vst).
    n_pad = pl.cdiv(N, _LANE) * _LANE
    tm = tn = _pick_tile(n_pad)

    if n_pad != N:
        x_pad = jnp.zeros((n_pad, D), jnp.float32).at[:N, :].set(x)
    else:
        x_pad = x

    # Precompute squared norms in BOTH layouts so the kernel never transposes.
    sqn_row = jnp.sum(x_pad * x_pad, axis=-1, keepdims=True)   # (n_pad, 1)
    sqn_col = sqn_row.reshape(1, n_pad)                        # (1, n_pad)

    # Pack scalars once (removes an in-kernel scalar divide per grid step).
    lin_s, rbf_out, rbf_len, cos_s = params[0], params[1], params[2], params[3]
    packed = jnp.stack(
        [lin_s, rbf_out, 0.5 / (rbf_len * rbf_len), cos_s]
    ).astype(jnp.float32)

    grid = (n_pad // tm, n_pad // tn)
    out_shape = jax.ShapeDtypeStruct((NUM_KERNELS, n_pad, n_pad), jnp.float32)
    # NOTE: output stays float32 to match the module's semantics; cast to bf16
    # at the store if downstream tolerates it (halves HBM writeback).

    out = pl.pallas_call(
        _combined_kernels_kernel,
        out_shape=out_shape,
        grid=grid,
        in_specs=[
            pl.BlockSpec(memory_space=pltpu.MemorySpace.SMEM),   # packed scalars
            pl.BlockSpec((tm, D), lambda i, j: (i, 0)),          # row tile of x
            pl.BlockSpec((tn, D), lambda i, j: (j, 0)),          # column tile of x
            pl.BlockSpec((tm, 1), lambda i, j: (i, 0)),          # row sq-norms
            pl.BlockSpec((1, tn), lambda i, j: (0, j)),          # col sq-norms
        ],
        out_specs=pl.BlockSpec((NUM_KERNELS, tm, tn), lambda i, j: (0, i, j)),
        compiler_params=pltpu.CompilerParams(
            dimension_semantics=("parallel", "parallel"),
            vmem_limit_bytes=32 * 1024 * 1024,
        ),
    )(packed, x_pad, x_pad, sqn_row, sqn_col)

    if n_pad != N:
        out = out[:, :N, :N]
    return out


def _reference(x, params):
    lin_s, rbf_o, rbf_l, cos_s = params[0], params[1], params[2], params[3]
    g = x @ x.T
    sq = jnp.sum(x * x, axis=-1, keepdims=True)
    lin = lin_s * g
    d2 = jnp.maximum(sq + sq.T - 2.0 * g, 0.0)
    rbf = rbf_o * jnp.exp(-0.5 * d2 / (rbf_l * rbf_l))
    inv_n = lax.rsqrt(sq + 1e-12)
    cos = cos_s * g * inv_n * inv_n.T
    return jnp.stack([lin, rbf, cos], axis=0)


if __name__ == "__main__":
    key = jax.random.PRNGKey(0)
    N, D = 16, 32
    x = jax.random.normal(key, (N, D), dtype=jnp.float32)

    # Deterministic "learned" kernel hyperparameters (synthetic init).
    params = jnp.array(
        [1.0,   # linear outputscale
         0.75,  # rbf outputscale
         1.5,   # rbf lengthscale
         1.25], # cosine outputscale
        dtype=jnp.float32,
    )

    out = combined_kernels_forward(x, params)
    out = jax.block_until_ready(out)

    ref = _reference(x, params)
    assert out.shape == (NUM_KERNELS, N, N), out.shape
    assert jnp.allclose(out, ref, atol=1e-4, rtol=1e-4), float(
        jnp.max(jnp.abs(out - ref))
    )
    print("KERNEL_OK")
</pallas_src>

<mosaic_0001>
module attributes {stable_mosaic.version = 11 : i64} {
  func.func @_combined_kernels_kernel(%arg0: i32, %arg1: i32, %arg2: memref<4xf32, #tpu.memory_space<smem>>, %arg3: memref<128x32xf32, #tpu.memory_space<vmem>>, %arg4: memref<128x32xf32, #tpu.memory_space<vmem>>, %arg5: memref<128x1xf32, #tpu.memory_space<vmem>>, %arg6: memref<1x128xf32, #tpu.memory_space<vmem>>, %arg7: memref<3x128x128xf32, #tpu.memory_space<vmem>>) attributes {dimension_semantics = [#tpu.dimension_semantics<parallel>, #tpu.dimension_semantics<parallel>], iteration_bounds = array<i64: 1, 1>, scalar_prefetch = 0 : i64, scratch_operands = 0 : i64, tpu.core_type = #tpu.core_type<tc>, window_params = [{transform_indices = @transform_0, window_bounds = array<i64: 4>}, {transform_indices = @transform_1, window_bounds = array<i64: 128, 32>}, {transform_indices = @transform_2, window_bounds = array<i64: 128, 32>}, {transform_indices = @transform_3, window_bounds = array<i64: 128, 1>}, {transform_indices = @transform_4, window_bounds = array<i64: 1, 128>}, {transform_indices = @transform_5, window_bounds = array<i64: 3, 128, 128>}]} {
    %c0 = arith.constant 0 : index
    %0 = memref.load %arg2[%c0] : memref<4xf32, #tpu.memory_space<smem>>
    %c1 = arith.constant 1 : index
    %1 = memref.load %arg2[%c1] : memref<4xf32, #tpu.memory_space<smem>>
    %c2 = arith.constant 2 : index
    %2 = memref.load %arg2[%c2] : memref<4xf32, #tpu.memory_space<smem>>
    %c3 = arith.constant 3 : index
    %3 = memref.load %arg2[%c3] : memref<4xf32, #tpu.memory_space<smem>>
    %c0_0 = arith.constant 0 : index
    %c0_1 = arith.constant 0 : index
    %4 = vector.load %arg3[%c0_0, %c0_1] : memref<128x32xf32, #tpu.memory_space<vmem>>, vector<128x32xf32>
    %c0_2 = arith.constant 0 : index
    %c0_3 = arith.constant 0 : index
    %5 = vector.load %arg4[%c0_2, %c0_3] : memref<128x32xf32, #tpu.memory_space<vmem>>, vector<128x32xf32>
    %cst = arith.constant dense<0.000000e+00> : vector<128x128xf32>
    %6 = tpu.matmul %4, %5, %cst {dimension_numbers = #tpu.dot_dimension_numbers<[1], [1], [0], [0], [0, 0, 1, 0], [], []>} : vector<128x32xf32>, vector<128x32xf32>, vector<128x128xf32> -> vector<128x128xf32>
    %c0_4 = arith.constant 0 : index
    %c0_5 = arith.constant 0 : index
    %7 = vector.load %arg5[%c0_4, %c0_5] : memref<128x1xf32, #tpu.memory_space<vmem>>, vector<128x1xf32>
    %c0_6 = arith.constant 0 : index
    %c0_7 = arith.constant 0 : index
    %8 = vector.load %arg6[%c0_6, %c0_7] : memref<1x128xf32, #tpu.memory_space<vmem>>, vector<1x128xf32>
    %9 = vector.broadcast %0 : f32 to vector<128x128xf32>
    %10 = arith.mulf %9, %6 : vector<128x128xf32>
    %c0_8 = arith.constant 0 : index
    %c0_9 = arith.constant 0 : index
    %c0_10 = arith.constant 0 : index
    %11 = vector.load %arg7[%c0_8, %c0_9, %c0_10] : memref<3x128x128xf32, #tpu.memory_space<vmem>>, vector<1x128x128xf32>
    %12 = vector.shape_cast %11 : vector<1x128x128xf32> to vector<128x128xf32>
    %13 = vector.shape_cast %10 : vector<128x128xf32> to vector<1x128x128xf32>
    tpu.vector_store %arg7[%c0_8, %c0_9, %c0_10], %13 {strides = array<i32>} : memref<3x128x128xf32, #tpu.memory_space<vmem>>, vector<1x128x128xf32>,
    %14 = vector.broadcast %7 : vector<128x1xf32> to vector<128x128xf32>
    %15 = vector.broadcast %8 : vector<1x128xf32> to vector<128x128xf32>
    %16 = arith.addf %14, %15 : vector<128x128xf32>
    %cst_11 = arith.constant 2.000000e+00 : f32
    %17 = vector.broadcast %cst_11 : f32 to vector<128x128xf32>
    %18 = arith.mulf %17, %6 : vector<128x128xf32>
    %19 = arith.subf %16, %18 : vector<128x128xf32>
    %cst_12 = arith.constant 0.000000e+00 : f32
    %20 = vector.broadcast %cst_12 : f32 to vector<128x128xf32>
    %21 = arith.maximumf %19, %20 : vector<128x128xf32>
    %cst_13 = arith.constant 0.000000e+00 : f32
    %22 = vector.broadcast %cst_13 : f32 to vector<128x128xf32>
    %23 = arith.subf %22, %21 : vector<128x128xf32>
    %24 = vector.broadcast %2 : f32 to vector<128x128xf32>
    %25 = arith.mulf %23, %24 : vector<128x128xf32>
    %26 = math.exp %25 : vector<128x128xf32>
    %27 = vector.broadcast %1 : f32 to vector<128x128xf32>
    %28 = arith.mulf %27, %26 : vector<128x128xf32>
    %c1_14 = arith.constant 1 : index
    %c0_15 = arith.constant 0 : index
    %c0_16 = arith.constant 0 : index
    %29 = vector.load %arg7[%c1_14, %c0_15, %c0_16] : memref<3x128x128xf32, #tpu.memory_space<vmem>>, vector<1x128x128xf32>
    %30 = vector.shape_cast %29 : vector<1x128x128xf32> to vector<128x128xf32>
    %31 = vector.shape_cast %28 : vector<128x128xf32> to vector<1x128x128xf32>
    tpu.vector_store %arg7[%c1_14, %c0_15, %c0_16], %31 {strides = array<i32>} : memref<3x128x128xf32, #tpu.memory_space<vmem>>, vector<1x128x128xf32>,
    %cst_17 = arith.constant 9.99999996E-13 : f32
    %32 = vector.broadcast %cst_17 : f32 to vector<128x1xf32>
    %33 = arith.addf %7, %32 : vector<128x1xf32>
    %34 = math.rsqrt %33 : vector<128x1xf32>
    %cst_18 = arith.constant 9.99999996E-13 : f32
    %35 = vector.broadcast %cst_18 : f32 to vector<1x128xf32>
    %36 = arith.addf %8, %35 : vector<1x128xf32>
    %37 = math.rsqrt %36 : vector<1x128xf32>
    %38 = vector.broadcast %3 : f32 to vector<128x128xf32>
    %39 = arith.mulf %38, %6 : vector<128x128xf32>
    %40 = vector.broadcast %34 : vector<128x1xf32> to vector<128x128xf32>
    %41 = arith.mulf %39, %40 : vector<128x128xf32>
    %42 = vector.broadcast %37 : vector<1x128xf32> to vector<128x128xf32>
    %43 = arith.mulf %41, %42 : vector<128x128xf32>
    %c2_19 = arith.constant 2 : index
    %c0_20 = arith.constant 0 : index
    %c0_21 = arith.constant 0 : index
    %44 = vector.load %arg7[%c2_19, %c0_20, %c0_21] : memref<3x128x128xf32, #tpu.memory_space<vmem>>, vector<1x128x128xf32>
    %45 = vector.shape_cast %44 : vector<1x128x128xf32> to vector<128x128xf32>
    %46 = vector.shape_cast %43 : vector<128x128xf32> to vector<1x128x128xf32>
    tpu.vector_store %arg7[%c2_19, %c0_20, %c0_21], %46 {strides = array<i32>} : memref<3x128x128xf32, #tpu.memory_space<vmem>>, vector<1x128x128xf32>,
    return
  }
  func.func @transform_0(%arg0: i32, %arg1: i32) -> i32 {
    %c0_i32 = arith.constant 0 : i32
    %c0_i32_0 = arith.constant 0 : i32
    return %c0_i32 : i32
  }
  func.func @transform_1(%arg0: i32, %arg1: i32) -> (i32, i32) {
    %c0_i32 = arith.constant 0 : i32
    %c0_i32_0 = arith.constant 0 : i32
    return %arg0, %c0_i32 : i32, i32
  }
  func.func @transform_2(%arg0: i32, %arg1: i32) -> (i32, i32) {
    %c0_i32 = arith.constant 0 : i32
    %c0_i32_0 = arith.constant 0 : i32
    return %arg1, %c0_i32 : i32, i32
  }
  func.func @transform_3(%arg0: i32, %arg1: i32) -> (i32, i32) {
    %c0_i32 = arith.constant 0 : i32
    %c0_i32_0 = arith.constant 0 : i32
    return %arg0, %c0_i32 : i32, i32
  }
  func.func @transform_4(%arg0: i32, %arg1: i32) -> (i32, i32) {
    %c0_i32 = arith.constant 0 : i32
    %c0_i32_0 = arith.constant 0 : i32
    return %c0_i32, %arg1 : i32, i32
  }
  func.func @transform_5(%arg0: i32, %arg1: i32) -> (i32, i32, i32) {
    %c0_i32 = arith.constant 0 : i32
    %c0_i32_0 = arith.constant 0 : i32
    return %c0_i32, %arg0, %arg1 : i32, i32, i32
  }
}

</mosaic_0001>

<bundles_post_ra>
// kernel: tpu_custom_call.1
= control target key start
LH: loop header
LB: loop body
LE: loop exit
PB: predicated region body
PF: predicated region fallthrough
CT: control target
= control target key end

     0   :  { %10 = vsyncpa [#allocation4], 0  ;;  %s1587_s0 = inlined_call_operand.vmem [shape: f32[4], index: 0, kind: input, shape index: {}]   ;;  %s1588_s1 = inlined_call_operand.vmem [shape: f32[128,32], index: 1, kind: input, shape index: {}]   ;;  %s1589_s2 = inlined_call_operand.vmem [shape: f32[128,32], index: 2, kind: input, shape index: {}]   ;;  %s1590_s3 = inlined_call_operand.vmem [shape: f32[128,1], index: 3, kind: input, shape index: {}]   ;;  %s1591_s4 = inlined_call_operand.vmem [shape: f32[1,128], index: 4, kind: input, shape index: {}]   ;;  %s1592_s5 = inlined_call_operand.hbm [shape: f32[3,128,128], index: 5, kind: output, shape index: {}]  }
   0x1   :  { %11 = vsyncpa [#allocation3], 0  ;;  %s18_s20 = sshll.u32 %s1587_s0, 4  ;;  %s19_s20 = int_to_ptr.vmem [resolvable:$true] %s18_s20 }
   0x2   :  { %s1074_s21 = scalar_lea.vmem %s19_s20, 16  ;;  %p1079_p1 = scmp.lt.s32.totalorder %s19_s20, %s19_s20 }
   0x3   :  { %p1075_p0 = scmp.ne.s32.totalorder %s19_s20, %s1074_s21  ;;  %p1080_p2 = scmp.lt.s32.totalorder %s1074_s21, %s1074_s21 }
   0x5   :  { %p1081_p3 = por %p1080_p2, %p1079_p1 }
   0x7   :  { %p1082_p4 = pnand %p1081_p3, %p1075_p0 }
   0x9   :  { %1085 = shalt.err (!%p1082_p4)
}
   0xa   :  { %s1112_s22 = smov [#allocation2]  }
   0xb   :  { %21 = dma.vmem_to_smem %s19_s20, 16, %s1112_s22, [#allocation4]  }
   0xc   :  { %1108 = dma.done.wait [#allocation4], 16  }
   0xd   :  { %1109 = vsyncadd [#allocation4], 4294967280 }
   0xe   :  { %33 = sfence }
   0xf   :  { %v54_v0 = vld [vmem:[%s1589_s2] sm:$0xff]  ;;  %v55_v1 = vld [vmem:[%s1589_s2 + $0x8] sm:$0xff]  ;;  %vm70_vm0 = vcmask 261120   ;;  %v56_v2 = vld [vmem:[%s1589_s2 + $0x10] sm:$0xff]  ;;  %v1113_v6 = vmov 0   ;;  %s34_s12 = sld [smem:[#allocation2]] }
  0x10   :  { %v937_v3 = vpack.c.bf16 %v55_v1, %v54_v0  ;;  %vm1161_vm1 = vmpackc.low %vm70_vm0, %vm70_vm0  ;;  %v57_v5 = vld [vmem:[%s1589_s2 + $0x18] sm:$0xff]  ;;  %1007 = vset.pattern.permute.xlu1 %v1113_v6  ;;  %1006 = vset.pattern.permute.xlu0 %v1113_v6  ;;  %v58_v8 = vld [vmem:[%s1589_s2 + $0x20] sm:$0xff]  ;;  %s816_s13 = sld [smem:[#allocation2 + $0x3]]  ;;  %s815_s14 = sld [smem:[#allocation2 + $0x2]] }
  0x11   :  { %v943_v7 = vpack.c.bf16 %v57_v5, %v56_v2  ;;  %v59_v9 = vld [vmem:[%s1589_s2 + $0x28] sm:$0xff]  ;;  %v314_v10 = vld [vmem:[%s1590_s3 + $0x10] sm:$0xff]  ;;  %v312_v11 = vld [vmem:[%s1590_s3] sm:$0xff]  ;;  %s1114_s15 = smov [#allocation5]  }
  0x12   :  { %939 = vmatprep.subr.msk.bf16.mxu0 %vm1161_vm1, %v937_v3  ;;  %985 = vmatprep.subr.msk.bf16.mxu1 %vm1161_vm1, %v937_v3  ;;  %v38_v12 = vld [vmem:[%s1588_s1] sm:$0xff]  ;;  %v315_v14 = vld [vmem:[%s1590_s3 + $0x18] sm:$0xff]  ;;  %v313_v15 = vld [vmem:[%s1590_s3 + $0x8] sm:$0xff]  ;;  %v949_v16 = vpack.c.bf16 %v59_v9, %v58_v8  ;;  %v611_v29 = vadd.f32 1e-12, %v312_v11  ;;  %s802_s16 = sshll.u32 %s1114_s15, 4  ;;  %s803_s16 = int_to_ptr.vmem [resolvable:$true] %s802_s16 }
  0x13   :  { %942 = vmatpush3.bf16.xpose.msk.msra.mxu0 %vm1161_vm1, %v937_v3  ;;  %993 = vmatpush3.bf16.xpose.msk.msra.mxu1 %vm1161_vm1, %v937_v3  ;;  %v46_v13 = vld [vmem:[%s1588_s1 + $0x40] sm:$0xff]  ;;  %v317_v17 = vld [vmem:[%s1590_s3 + $0x28] sm:$0xff]  ;;  %v60_v19 = vld [vmem:[%s1589_s2 + $0x30] sm:$0xff]  ;;  %v612_v26 = vadd.f32 1e-12, %v313_v15  ;;  %s1086_s17 = scalar_lea.vmem %s803_s16, 6144  ;;  %p1091_p6 = scmp.lt.s32.totalorder %s803_s16, %s803_s16 }
  0x14   :  { %945 = vmatprep.subr.msk.bf16.mxu0 %vm1161_vm1, %v943_v7  ;;  %986 = vmatprep.subr.msk.bf16.mxu1 %vm1161_vm1, %v943_v7  ;;  %v316_v18 = vld [vmem:[%s1590_s3 + $0x20] sm:$0xff]  ;;  %v61_v20 = vld [vmem:[%s1589_s2 + $0x38] sm:$0xff]  ;;  %v318_v22 = vld [vmem:[%s1590_s3 + $0x30] sm:$0xff]  ;;  %v614_v33 = vadd.f32 1e-12, %v315_v14  ;;  %p1087_p5 = scmp.ne.s32.totalorder %s803_s16, %s1086_s17  ;;  %p1092_p7 = scmp.lt.s32.totalorder %s1086_s17, %s1086_s17 }
  0x15   :  { %374 = vperm.xlu1 %1007, %v314_v10   ;;  %364 = vperm.xlu0 %1006, %v312_v11   ;;  %v319_v21 = vld [vmem:[%s1590_s3 + $0x38] sm:$0xff]  ;;  %v955_v23 = vpack.c.bf16 %v61_v20, %v60_v19  ;;  %v321_v24 = vld [vmem:[%s1590_s3 + $0x48] sm:$0xff]  ;;  %v320_v25 = vld [vmem:[%s1590_s3 + $0x40] sm:$0xff]  ;;  %1008 = vrsqrt.f32 %v612_v26  ;;  %v613_v34 = vadd.f32 1e-12, %v314_v10 }
  0x16   :  { %913 = vmatprep.mubr.msk.f32.mxu0 %vm70_vm0, %v38_v12  ;;  %925 = vmatprep.mubr.msk.f32.mxu1 %vm70_vm0, %v46_v13  ;;  %v62_v27 = vld [vmem:[%s1589_s2 + $0x40] sm:$0xff]  ;;  %v63_v28 = vld [vmem:[%s1589_s2 + $0x48] sm:$0xff]  ;;  %v323_v30 = vld [vmem:[%s1590_s3 + $0x58] sm:$0xff]  ;;  %1010 = vrsqrt.f32 %v611_v29  ;;  %v616_v37 = vadd.f32 1e-12, %v317_v17  ;;  %p1093_p8 = por %p1092_p7, %p1091_p6 }
  0x17   :  { %v322_v31 = vld [vmem:[%s1590_s3 + $0x50] sm:$0xff]  ;;  %v961_v32 = vpack.c.bf16 %v63_v28, %v62_v27  ;;  %v325_v35 = vld [vmem:[%s1590_s3 + $0x68] sm:$0xff]  ;;  %v324_v36 = vld [vmem:[%s1590_s3 + $0x60] sm:$0xff]  ;;  %1012 = vrsqrt.f32 %v614_v33  ;;  %v615_v40 = vadd.f32 1e-12, %v316_v18 }
  0x18   :  { %v64_v38 = vld [vmem:[%s1589_s2 + $0x50] sm:$0xff]  ;;  %v65_v39 = vld [vmem:[%s1589_s2 + $0x58] sm:$0xff]  ;;  %1014 = vrsqrt.f32 %v613_v34  ;;  %v618_v44 = vadd.f32 1e-12, %v319_v21  ;;  %v617_v45 = vadd.f32 1e-12, %v318_v22  ;;  %p1094_p9 = pnand %p1093_p8, %p1087_p5 }
  0x19   :  { %379 = vperm.xlu1 %1007, %v315_v14   ;;  %369 = vperm.xlu0 %1006, %v313_v15   ;;  %v327_v41 = vld [vmem:[%s1590_s3 + $0x78] sm:$0xff]  ;;  %v326_v42 = vld [vmem:[%s1590_s3 + $0x70] sm:$0xff]  ;;  %v967_v43 = vpack.c.bf16 %v65_v39, %v64_v38  ;;  %1016 = vrsqrt.f32 %v616_v37  ;;  %v620_v48 = vadd.f32 1e-12, %v321_v24  ;;  %v66_v49 = vld [vmem:[%s1589_s2 + $0x60] sm:$0xff] }
  0x1a   :  { %1018 = vrsqrt.f32 %v615_v40  ;;  %v67_v50 = vld [vmem:[%s1589_s2 + $0x68] sm:$0xff]  ;;  %v619_v51 = vadd.f32 1e-12, %v320_v25  ;;  %v622_v55 = vadd.f32 1e-12, %v323_v30  ;;  %v68_v60 = vld [vmem:[%s1589_s2 + $0x70] sm:$0xff] }
  0x1b   :  { %948 = vmatpush3.bf16.xpose.msk.msra.mxu0 %vm1161_vm1, %v943_v7  ;;  %994 = vmatpush3.bf16.xpose.msk.msra.mxu1 %vm1161_vm1, %v943_v7  ;;  %1020 = vrsqrt.f32 %v618_v44  ;;  %v973_v54 = vpack.c.bf16 %v67_v50, %v66_v49  ;;  %v621_v56 = vadd.f32 1e-12, %v322_v31  ;;  %v624_v59 = vadd.f32 1e-12, %v325_v35  ;;  %v69_v61 = vld [vmem:[%s1589_s2 + $0x78] sm:$0xff]  ;;  %v39_v12 = vld [vmem:[%s1588_s1 + $0x8] sm:$0xff] }
  0x1c   :  { %951 = vmatprep.subr.msk.bf16.mxu0 %vm1161_vm1, %v949_v16  ;;  %987 = vmatprep.subr.msk.bf16.mxu1 %vm1161_vm1, %v949_v16  ;;  %1022 = vrsqrt.f32 %v617_v45  ;;  %v623_v62 = vadd.f32 1e-12, %v324_v36  ;;  %v979_v1 = vpack.c.bf16 %v69_v61, %v68_v60  ;;  %v626_v2 = vadd.f32 1e-12, %v327_v41  ;;  %v47_v13 = vld [vmem:[%s1588_s1 + $0x48] sm:$0xff]  ;;  %v40_v14 = vld [vmem:[%s1588_s1 + $0x10] sm:$0xff] }
  0x1d   :  { %389 = vperm.xlu1 %1007, %v317_v17   ;;  %384 = vperm.xlu0 %1006, %v316_v18   ;;  %1024 = vrsqrt.f32 %v620_v48  ;;  %v625_v6 = vadd.f32 1e-12, %v326_v42  ;;  %v48_v4 = vld [vmem:[%s1588_s1 + $0x50] sm:$0xff]  ;;  %v49_v17 = vld [vmem:[%s1588_s1 + $0x58] sm:$0xff]  ;;  %v42_v18 = vld [vmem:[%s1588_s1 + $0x20] sm:$0xff]  ;;  %v443_v45 = vlaneseq }
  0x1e   :  { %1026 = vrsqrt.f32 %v619_v51  ;;  %v50_v19 = vld [vmem:[%s1588_s1 + $0x60] sm:$0xff]  ;;  %v43_v20 = vld [vmem:[%s1588_s1 + $0x28] sm:$0xff] }
  0x1f   :  { %v1009_v46 = vpop.eup %1008  ;;  %1028 = vrsqrt.f32 %v622_v55 }
  0x20   :  { %v1011_v47 = vpop.eup %1010  ;;  %1030 = vrsqrt.f32 %v621_v56 }
  0x21   :  { %399 = vperm.xlu1 %1007, %v319_v21   ;;  %394 = vperm.xlu0 %1006, %v318_v22   ;;  %v1013_v52 = vpop.eup %1012  ;;  %1032 = vrsqrt.f32 %v624_v59  ;;  %v51_v21 = vld [vmem:[%s1588_s1 + $0x68] sm:$0xff]  ;;  %v44_v22 = vld [vmem:[%s1588_s1 + $0x30] sm:$0xff] }
  0x22   :  { %v1015_v53 = vpop.eup %1014  ;;  %1034 = vrsqrt.f32 %v623_v62 }
  0x23   :  { %954 = vmatpush3.bf16.xpose.msk.msra.mxu0 %vm1161_vm1, %v949_v16  ;;  %995 = vmatpush3.bf16.xpose.msk.msra.mxu1 %vm1161_vm1, %v949_v16  ;;  %v1017_v57 = vpop.eup %1016  ;;  %1036 = vrsqrt.f32 %v626_v2  ;;  %v41_v16 = vld [vmem:[%s1588_s1 + $0x18] sm:$0xff] }
  0x24   :  { %957 = vmatprep.subr.msk.bf16.mxu0 %vm1161_vm1, %v955_v23  ;;  %988 = vmatprep.subr.msk.bf16.mxu1 %vm1161_vm1, %v955_v23  ;;  %v1019_v58 = vpop.eup %1018  ;;  %1038 = vrsqrt.f32 %v625_v6 }
  0x25   :  { %409 = vperm.xlu1 %1007, %v321_v24   ;;  %404 = vperm.xlu0 %1006, %v320_v25   ;;  %v1021_v63 = vpop.eup %1020  ;;  %v45_v24 = vld [vmem:[%s1588_s1 + $0x38] sm:$0xff] }
  0x26   :  { %v1023_v0 = vpop.eup %1022  ;;  %v53_v25 = vld [vmem:[%s1588_s1 + $0x78] sm:$0xff] }
  0x27   :  { %v1025_v3 = vpop.eup %1024 }
  0x28   :  { %v1027_v5 = vpop.eup %1026 }
  0x29   :  { %419 = vperm.xlu1 %1007, %v323_v30   ;;  %414 = vperm.xlu0 %1006, %v322_v31   ;;  %v1029_v7 = vpop.eup %1028 }
  0x2a   :  { %v1031_v8 = vpop.eup %1030 }
  0x2b   :  { %960 = vmatpush3.bf16.xpose.msk.msra.mxu0 %vm1161_vm1, %v955_v23  ;;  %996 = vmatpush3.bf16.xpose.msk.msra.mxu1 %vm1161_vm1, %v955_v23  ;;  %v1033_v9 = vpop.eup %1032  ;;  %v52_v23 = vld [vmem:[%s1588_s1 + $0x70] sm:$0xff] }
  0x2c   :  { %963 = vmatprep.subr.msk.bf16.mxu0 %vm1161_vm1, %v961_v32  ;;  %989 = vmatprep.subr.msk.bf16.mxu1 %vm1161_vm1, %v961_v32  ;;  %v1035_v10 = vpop.eup %1034 }
  0x2d   :  { %429 = vperm.xlu1 %1007, %v325_v35   ;;  %424 = vperm.xlu0 %1006, %v324_v36   ;;  %v1037_v11 = vpop.eup %1036 }
  0x2e   :  { %v1039_v15 = vpop.eup %1038 }
  0x31   :  { %439 = vperm.xlu1 %1007, %v327_v41   ;;  %434 = vperm.xlu0 %1006, %v326_v42   ;;  %v328_v42 = vld [vmem:[%s1591_s4] sm:$0x1]  ;;  %s814_s4 = sld [smem:[#allocation2 + $0x1]] }
  0x33   :  { %966 = vmatpush3.bf16.xpose.msk.msra.mxu0 %vm1161_vm1, %v961_v32  ;;  %997 = vmatpush3.bf16.xpose.msk.msra.mxu1 %vm1161_vm1, %v961_v32 }
  0x34   :  { %969 = vmatprep.subr.msk.bf16.mxu0 %vm1161_vm1, %v967_v43  ;;  %990 = vmatprep.subr.msk.bf16.mxu1 %vm1161_vm1, %v967_v43 }
  0x35   :  { %669 = vperm.xlu1 %1007, %v1009_v46   ;;  %664 = vperm.xlu0 %1006, %v1011_v47   ;;  %v444_v47 = vshrl.u32 %v443_v45, 7 }
  0x37   :  { %v445_v50 = vsub.s32 0, %v444_v47 }
  0x39   :  { %679 = vperm.xlu1 %1007, %v1013_v52   ;;  %674 = vperm.xlu0 %1006, %v1015_v53   ;;  %v446_v53 = vrot.slane %v328_v42, %v445_v50 }
  0x3b   :  { %972 = vmatpush3.bf16.xpose.msk.msra.mxu0 %vm1161_vm1, %v967_v43  ;;  %998 = vmatpush3.bf16.xpose.msk.msra.mxu1 %vm1161_vm1, %v967_v43  ;;  %v643_v43 = vadd.f32 1e-12, %v328_v42 }
  0x3c   :  { %975 = vmatprep.subr.msk.bf16.mxu0 %vm1161_vm1, %v973_v54  ;;  %991 = vmatprep.subr.msk.bf16.mxu1 %vm1161_vm1, %v973_v54 }
  0x3d   :  { %689 = vperm.xlu1 %1007, %v1017_v57   ;;  %684 = vperm.xlu0 %1006, %v1019_v58   ;;  %1040 = vrsqrt.f32 %v643_v43 }
  0x41   :  { %699 = vperm.xlu1 %1007, %v1021_v63   ;;  %694 = vperm.xlu0 %1006, %v1023_v0  }
  0x43   :  { %978 = vmatpush3.bf16.xpose.msk.msra.mxu0 %vm1161_vm1, %v973_v54  ;;  %999 = vmatpush3.bf16.xpose.msk.msra.mxu1 %vm1161_vm1, %v973_v54 }
  0x44   :  { %981 = vmatprep.subr.msk.bf16.mxu0 %vm1161_vm1, %v979_v1  ;;  %992 = vmatprep.subr.msk.bf16.mxu1 %vm1161_vm1, %v979_v1 }
  0x45   :  { %709 = vperm.xlu1 %1007, %v1025_v3   ;;  %704 = vperm.xlu0 %1006, %v1027_v5   ;;  %v1409_v3 = vstv %s34_s12  ;;  %v1411_v5 = vstv %s816_s13 }
  0x47   :  { %v1041_v52 = vpop.eup %1040 }
  0x48   :  { %v1393_v55 = vrot.slane %v1041_v52, %v445_v50 }
  0x49   :  { %719 = vperm.xlu1 %1007, %v1029_v7   ;;  %714 = vperm.xlu0 %1006, %v1031_v8  }
  0x4b   :  { %984 = vmatpush3.bf16.xpose.msk.msra.mxu0 %vm1161_vm1, %v979_v1  ;;  %1000 = vmatpush3.bf16.xpose.msk.msra.mxu1 %vm1161_vm1, %v979_v1 }
  0x4d   :  { %729 = vperm.xlu1 %1007, %v1033_v9   ;;  %724 = vperm.xlu0 %1006, %v1035_v10   ;;  %v1421_v10 = vstv %s815_s14 }
  0x51   :  { %739 = vperm.xlu1 %1007, %v1037_v11   ;;  %734 = vperm.xlu0 %1006, %v1039_v15  }
  0x52   :  { %914 = vmatmul.mubr.msk.f32.vlgmr.msra.gmra.mrb[0].mxu0 %vm70_vm0, %v39_v12  ;;  %926 = vmatmul.mubr.msk.f32.vlgmr.msra.gmra.mrb[0].mxu1 %vm70_vm0, %v47_v13 }
  0x53   :  { %916 = vmatprep.mubr.msk.f32.mxu0 %vm70_vm0, %v40_v14  ;;  %928 = vmatprep.mubr.msk.f32.mxu1 %vm70_vm0, %v48_v4  ;;  %v1429_v4 = vstv %s814_s4 }
  0x56   :  { %917 = vmatmul.mubr.msk.f32.gmra.mrb[2].mxu0 %vm70_vm0, %v41_v16  ;;  %929 = vmatmul.mubr.msk.f32.gmra.mrb[2].mxu1 %vm70_vm0, %v49_v17 }
  0x57   :  { %919 = vmatprep.mubr.msk.f32.mxu0 %vm70_vm0, %v42_v18  ;;  %931 = vmatprep.mubr.msk.f32.mxu1 %vm70_vm0, %v50_v19 }
  0x5a   :  { %920 = vmatmul.mubr.msk.f32.gmra.mrb[4].mxu0 %vm70_vm0, %v43_v20  ;;  %932 = vmatmul.mubr.msk.f32.gmra.mrb[4].mxu1 %vm70_vm0, %v51_v21 }
  0x5b   :  { %922 = vmatprep.mubr.msk.f32.mxu0 %vm70_vm0, %v44_v22  ;;  %934 = vmatprep.mubr.msk.f32.mxu1 %vm70_vm0, %v52_v23 }
  0x5e   :  { %923 = vmatmul.mubr.msk.f32.gmra.mrb[6].mxu0 %vm70_vm0, %v45_v24  ;;  %935 = vmatmul.mubr.msk.f32.gmra.mrb[6].mxu1 %vm70_vm0, %v53_v25 }
  0x94   :  { %v375_v26 = vpop.permute.xlu1 %374  ;;  %v365_v27 = vpop.permute.xlu0 %364 }
  0x95   :  { %v1395_v56 = vadd.f32 %v446_v53, %v375_v26  ;;  %v448_v57 = vadd.f32 %v446_v53, %v365_v27 }
  0x98   :  { %v380_v28 = vpop.permute.xlu1 %379  ;;  %v370_v29 = vpop.permute.xlu0 %369 }
  0x99   :  { %v1397_v58 = vadd.f32 %v446_v53, %v380_v28  ;;  %v449_v59 = vadd.f32 %v446_v53, %v370_v29 }
  0x9c   :  { %v390_v30 = vpop.permute.xlu1 %389  ;;  %v385_v31 = vpop.permute.xlu0 %384 }
  0x9d   :  { %v1399_v60 = vadd.f32 %v446_v53, %v390_v30  ;;  %v1401_v61 = vadd.f32 %v446_v53, %v385_v31 }
  0xa0   :  { %v400_v32 = vpop.permute.xlu1 %399  ;;  %v395_v33 = vpop.permute.xlu0 %394 }
  0xa1   :  { %v1403_v62 = vadd.f32 %v446_v53, %v400_v32  ;;  %v1405_v63 = vadd.f32 %v446_v53, %v395_v33 }
  0xa4   :  { %v410_v34 = vpop.permute.xlu1 %409  ;;  %v405_v35 = vpop.permute.xlu0 %404 }
  0xa5   :  { %v457_v1 = vadd.f32 %v446_v53, %v410_v34  ;;  %v456_v2 = vadd.f32 %v446_v53, %v405_v35 }
  0xa8   :  { %v420_v36 = vpop.permute.xlu1 %419  ;;  %v415_v37 = vpop.permute.xlu0 %414 }
  0xa9   :  { %v1413_v6 = vadd.f32 %v446_v53, %v420_v36  ;;  %v1415_v7 = vadd.f32 %v446_v53, %v415_v37 }
  0xac   :  { %v430_v38 = vpop.permute.xlu1 %429  ;;  %v425_v39 = vpop.permute.xlu0 %424 }
  0xad   :  { %v1417_v8 = vadd.f32 %v446_v53, %v430_v38  ;;  %v1423_v11 = vadd.f32 %v446_v53, %v425_v39 }
  0xb0   :  { %v440_v40 = vpop.permute.xlu1 %439  ;;  %v435_v41 = vpop.permute.xlu0 %434 }
  0xb1   :  { %v1425_v12 = vadd.f32 %v446_v53, %v440_v40  ;;  %v1427_v13 = vadd.f32 %v446_v53, %v435_v41 }
  0xb4   :  { %v670_v44 = vpop.permute.xlu1 %669  ;;  %v1383_v46 = vpop.permute.xlu0 %664 }
  0xb8   :  { %v1385_v48 = vpop.permute.xlu1 %679  ;;  %v1387_v49 = vpop.permute.xlu0 %674 }
  0xbc   :  { %v1389_v51 = vpop.permute.xlu1 %689  ;;  %v1391_v54 = vpop.permute.xlu0 %684 }
  0xc0   :  { %v1407_v0 = vpop.permute.xlu1 %699  ;;  %v1419_v9 = vpop.permute.xlu0 %694 }
  0xc4   :  { %v710_v26 = vpop.permute.xlu1 %709  ;;  %v705_v43 = vpop.permute.xlu0 %704 }
 0x125   :  { %v915_v14 = vpop.f32.mrb[0].mxu0  ;;  %v927_v15 = vpop.f32.mrb[0].mxu1 }
 0x126   :  { %v331_v16 = vmul.f32 %v915_v14, %v1409_v3  ;;  %v465_v17 = vmul.f32 2.0, %v915_v14  ;;  %v647_v18 = vmul.f32 %v915_v14, %v1411_v5  ;;  %v339_v19 = vmul.f32 %v927_v15, %v1409_v3  ;;  %v233_v20 = vpop.f32.mrb[1].mxu0  ;;  %v273_v21 = vpop.f32.mrb[1].mxu1 }
 0x127   :  { %v473_v22 = vmul.f32 2.0, %v927_v15  ;;  %v655_v23 = vmul.f32 %v927_v15, %v1411_v5  ;;  %v330_v24 = vmul.f32 %v1409_v3, %v233_v20  ;;  %v464_v25 = vmul.f32 2.0, %v233_v20 }
 0x128   :  { %347 = vst [vmem:[#allocation5 + $0x8] sm:$0xff] %v331_v16  ;;  %v481_v27 = vsub.f32 %v449_v59, %v465_v17  ;;  %v743_v28 = vmul.f32 %v670_v44, %v647_v18  ;;  %355 = vst [vmem:[#allocation5 + $0x48] sm:$0xff] %v339_v19  ;;  %v646_v29 = vmul.f32 %v1411_v5, %v233_v20  ;;  %v472_v34 = vmul.f32 2.0, %v273_v21 }
 0x129   :  { %v338_v30 = vmul.f32 %v1409_v3, %v273_v21  ;;  %v489_v31 = vsub.f32 %v457_v1, %v473_v22  ;;  %v751_v32 = vmul.f32 %v710_v26, %v655_v23  ;;  %346 = vst [vmem:[#allocation5] sm:$0xff] %v330_v24  ;;  %v480_v33 = vsub.f32 %v448_v57, %v464_v25  ;;  %v918_v35 = vpop.f32.mrb[2].mxu0  ;;  %v930_v36 = vpop.f32.mrb[2].mxu1 }
 0x12a   :  { %v497_v37 = vmax.f32 %v481_v27, 0.0  ;;  %v765_v38 = vmul.f32 %v1393_v55, %v743_v28  ;;  %v742_v39 = vmul.f32 %v1383_v46, %v646_v29  ;;  %v654_v40 = vmul.f32 %v1411_v5, %v273_v21  ;;  %v243_v41 = vpop.f32.mrb[3].mxu0  ;;  %v1441_v42 = vpop.f32.mrb[3].mxu1 }
 0x12b   :  { %354 = vst [vmem:[#allocation5 + $0x40] sm:$0xff] %v338_v30  ;;  %v505_v44 = vmax.f32 %v489_v31, 0.0  ;;  %v773_v45 = vmul.f32 %v1393_v55, %v751_v32  ;;  %v496_v47 = vmax.f32 %v480_v33, 0.0  ;;  %v488_v50 = vsub.f32 %v456_v2, %v472_v34  ;;  %v720_v31 = vpop.permute.xlu1 %719 }
 0x12c   :  { %v513_v52 = vsub.f32 0.0, %v497_v37  ;;  %782 = vst [vmem:[#allocation5 + $0x108] sm:$0xff] %v765_v38  ;;  %v764_v53 = vmul.f32 %v1393_v55, %v742_v39  ;;  %v750_v57 = vmul.f32 %v705_v43, %v654_v40  ;;  %v333_v59 = vmul.f32 %v918_v35, %v1409_v3 }
 0x12d   :  { %v521_v46 = vsub.f32 0.0, %v505_v44  ;;  %790 = vst [vmem:[#allocation5 + $0x148] sm:$0xff] %v773_v45  ;;  %v512_v1 = vsub.f32 0.0, %v496_v47  ;;  %v504_v14 = vmax.f32 %v488_v50, 0.0  ;;  %v467_v15 = vmul.f32 2.0, %v918_v35  ;;  %v1446_v16 = vpop.f32.mrb[4].mxu0 }
 0x12e   :  { %v1448_v17 = vpop.f32.mrb[4].mxu1  ;;  %v530_v18 = vmul.f32 %v1421_v10, %v513_v52  ;;  %781 = vst [vmem:[#allocation5 + $0x100] sm:$0xff] %v764_v53  ;;  %v772_v2 = vmul.f32 %v1393_v55, %v750_v57  ;;  %349 = vst [vmem:[#allocation5 + $0x18] sm:$0xff] %v333_v59  ;;  %v649_v19 = vmul.f32 %v918_v35, %v1411_v5  ;;  %v1454_v21 = vpop.f32.mrb[5].mxu0  ;;  %v475_v29 = vmul.f32 2.0, %v930_v36 }
 0x12f   :  { %v341_v20 = vmul.f32 %v930_v36, %v1409_v3  ;;  %v1456_v22 = vpop.f32.mrb[5].mxu1  ;;  %v538_v23 = vmul.f32 %v1421_v10, %v521_v46  ;;  %v529_v24 = vmul.f32 %v1421_v10, %v512_v1  ;;  %v520_v25 = vsub.f32 0.0, %v504_v14 }
 0x130   :  { %v483_v26 = vsub.f32 %v1397_v58, %v467_v15  ;;  %v547_v27 = vmul.f32 1.442695, %v530_v18  ;;  %789 = vst [vmem:[#allocation5 + $0x140] sm:$0xff] %v772_v2  ;;  %v745_v28 = vmul.f32 %v1385_v48, %v649_v19  ;;  %v657_v30 = vmul.f32 %v930_v36, %v1411_v5  ;;  %v715_v15 = vpop.permute.xlu0 %714 }
 0x131   :  { %357 = vst [vmem:[#allocation5 + $0x58] sm:$0xff] %v341_v20  ;;  %v563_v32 = vmul.f32 1.442695, %v538_v23  ;;  %v545_v33 = vmul.f32 1.442695, %v529_v24  ;;  %v537_v34 = vmul.f32 %v1421_v10, %v520_v25  ;;  %v1464_v37 = vpop.f32.mrb[6].mxu0  ;;  %v491_v58 = vsub.f32 %v1413_v6, %v475_v29 }
 0x132   :  { %v499_v35 = vmax.f32 %v483_v26, 0.0  ;;  %1042 = vpow2.f32 %v547_v27  ;;  %v767_v38 = vmul.f32 %v1393_v55, %v745_v28  ;;  %v753_v39 = vmul.f32 %v720_v31, %v657_v30  ;;  %v1468_v40 = vpop.f32.mrb[6].mxu1  ;;  %v1470_v48 = vpop.f32.mrb[7].mxu0 }
 0x133   :  { %1044 = vpow2.f32 %v563_v32  ;;  %v561_v36 = vmul.f32 1.442695, %v537_v34  ;;  %v332_v44 = vmul.f32 %v1409_v3, %v243_v41  ;;  %v1473_v45 = vpop.f32.mrb[7].mxu1  ;;  %v507_v47 = vmax.f32 %v491_v58, 0.0 }
 0x134   :  { %v515_v43 = vsub.f32 0.0, %v499_v35  ;;  %1046 = vpow2.f32 %v545_v33  ;;  %784 = vst [vmem:[#allocation5 + $0x118] sm:$0xff] %v767_v38  ;;  %v775_v50 = vmul.f32 %v1393_v55, %v753_v39  ;;  %v466_v52 = vmul.f32 2.0, %v243_v41  ;;  %v730_v38 = vpop.permute.xlu1 %729 }
 0x135   :  { %1048 = vpow2.f32 %v561_v36  ;;  %348 = vst [vmem:[#allocation5 + $0x10] sm:$0xff] %v332_v44  ;;  %v648_v53 = vmul.f32 %v1411_v5, %v243_v41  ;;  %v340_v57 = vmul.f32 %v1409_v3, %v1441_v42  ;;  %v523_v59 = vsub.f32 0.0, %v507_v47 }
 0x136   :  { %v532_v6 = vmul.f32 %v1421_v10, %v515_v43  ;;  %792 = vst [vmem:[#allocation5 + $0x158] sm:$0xff] %v775_v50  ;;  %v482_v46 = vsub.f32 %v1395_v56, %v466_v52  ;;  %v474_v1 = vmul.f32 2.0, %v1441_v42  ;;  %v656_v14 = vmul.f32 %v1411_v5, %v1441_v42 }
 0x137   :  { %v744_v2 = vmul.f32 %v1387_v49, %v648_v53  ;;  %356 = vst [vmem:[#allocation5 + $0x50] sm:$0xff] %v340_v57  ;;  %v335_v41 = vmul.f32 %v1446_v16, %v1409_v3  ;;  %v469_v19 = vmul.f32 2.0, %v1446_v16  ;;  %v540_v20 = vmul.f32 %v1421_v10, %v523_v59 }
 0x138   :  { %v551_v18 = vmul.f32 1.442695, %v532_v6  ;;  %v498_v23 = vmax.f32 %v482_v46, 0.0  ;;  %v490_v56 = vsub.f32 %v1415_v7, %v474_v1  ;;  %v752_v24 = vmul.f32 %v715_v15, %v656_v14 }
 0x139   :  { %v766_v25 = vmul.f32 %v1393_v55, %v744_v2  ;;  %351 = vst [vmem:[#allocation5 + $0x28] sm:$0xff] %v335_v41  ;;  %v485_v42 = vsub.f32 %v1399_v60, %v469_v19  ;;  %v651_v49 = vmul.f32 %v1446_v16, %v1411_v5  ;;  %v567_v26 = vmul.f32 1.442695, %v540_v20 }
 0x13a   :  { %1050 = vpow2.f32 %v551_v18  ;;  %v514_v27 = vsub.f32 0.0, %v498_v23  ;;  %v506_v28 = vmax.f32 %v490_v56, 0.0  ;;  %v774_v29 = vmul.f32 %v1393_v55, %v752_v24  ;;  %v725_v56 = vpop.permute.xlu0 %724 }
 0x13b   :  { %783 = vst [vmem:[#allocation5 + $0x110] sm:$0xff] %v766_v25  ;;  %v501_v30 = vmax.f32 %v485_v42, 0.0  ;;  %v747_v31 = vmul.f32 %v1389_v51, %v651_v49  ;;  %v343_v7 = vmul.f32 %v1448_v17, %v1409_v3  ;;  %v477_v32 = vmul.f32 2.0, %v1448_v17 }
 0x13c   :  { %v1043_v33 = vpop.eup %1042  ;;  %1052 = vpow2.f32 %v567_v26  ;;  %v531_v60 = vmul.f32 %v1421_v10, %v514_v27  ;;  %v522_v34 = vsub.f32 0.0, %v506_v28  ;;  %791 = vst [vmem:[#allocation5 + $0x150] sm:$0xff] %v774_v29  ;;  %v659_v16 = vmul.f32 %v1448_v17, %v1411_v5 }
 0x13d   :  { %v1045_v35 = vpop.eup %1044  ;;  %v579_v58 = vmul.f32 %v1043_v33, %v1429_v4  ;;  %v517_v39 = vsub.f32 0.0, %v501_v30  ;;  %v769_v51 = vmul.f32 %v1393_v55, %v747_v31  ;;  %359 = vst [vmem:[#allocation5 + $0x68] sm:$0xff] %v343_v7  ;;  %v493_v36 = vsub.f32 %v1417_v8, %v477_v32 }
 0x13e   :  { %v1047_v43 = vpop.eup %1046  ;;  %v587_v44 = vmul.f32 %v1045_v35, %v1429_v4  ;;  %v549_v47 = vmul.f32 1.442695, %v531_v60  ;;  %v539_v50 = vmul.f32 %v1421_v10, %v522_v34  ;;  %v755_v52 = vmul.f32 %v730_v38, %v659_v16  ;;  %v740_v38 = vpop.permute.xlu1 %739 }
 0x13f   :  { %v1049_v6 = vpop.eup %1048  ;;  %596 = vst [vmem:[#allocation5 + $0x88] sm:$0xff] %v579_v58  ;;  %v578_v17 = vmul.f32 %v1047_v43, %v1429_v4  ;;  %v534_v53 = vmul.f32 %v1421_v10, %v517_v39  ;;  %786 = vst [vmem:[#allocation5 + $0x128] sm:$0xff] %v769_v51  ;;  %v509_v57 = vmax.f32 %v493_v36, 0.0  ;;  %v334_v59 = vmul.f32 %v1409_v3, %v1454_v21 }
 0x140   :  { %604 = vst [vmem:[#allocation5 + $0xc8] sm:$0xff] %v587_v44  ;;  %v586_v8 = vmul.f32 %v1049_v6, %v1429_v4  ;;  %1054 = vpow2.f32 %v549_v47  ;;  %v565_v46 = vmul.f32 1.442695, %v539_v50  ;;  %v777_v1 = vmul.f32 %v1393_v55, %v755_v52 }
 0x141   :  { %595 = vst [vmem:[#allocation5 + $0x80] sm:$0xff] %v578_v17  ;;  %v555_v14 = vmul.f32 1.442695, %v534_v53  ;;  %v525_v15 = vsub.f32 0.0, %v509_v57  ;;  %350 = vst [vmem:[#allocation5 + $0x20] sm:$0xff] %v334_v59  ;;  %v468_v18 = vmul.f32 2.0, %v1454_v21  ;;  %v650_v2 = vmul.f32 %v1411_v5, %v1454_v21 }
 0x142   :  { %603 = vst [vmem:[#allocation5 + $0xc0] sm:$0xff] %v586_v8  ;;  %1056 = vpow2.f32 %v565_v46  ;;  %794 = vst [vmem:[#allocation5 + $0x168] sm:$0xff] %v777_v1  ;;  %v342_v41 = vmul.f32 %v1409_v3, %v1456_v22  ;;  %v476_v19 = vmul.f32 2.0, %v1456_v22  ;;  %v658_v20 = vmul.f32 %v1411_v5, %v1456_v22 }
 0x143   :  { %1058 = vpow2.f32 %v555_v14  ;;  %v542_v24 = vmul.f32 %v1421_v10, %v525_v15  ;;  %v484_v25 = vsub.f32 %v1401_v61, %v468_v18  ;;  %v746_v21 = vmul.f32 %v1391_v54, %v650_v2 }
 0x144   :  { %v1051_v23 = vpop.eup %1050  ;;  %358 = vst [vmem:[#allocation5 + $0x60] sm:$0xff] %v342_v41  ;;  %v492_v49 = vsub.f32 %v1423_v11, %v476_v19  ;;  %v754_v26 = vmul.f32 %v725_v56, %v658_v20  ;;  %v337_v27 = vmul.f32 %v1464_v37, %v1409_v3  ;;  %v471_v30 = vmul.f32 2.0, %v1464_v37 }
 0x145   :  { %v581_v42 = vmul.f32 %v1051_v23, %v1429_v4  ;;  %v571_v28 = vmul.f32 1.442695, %v542_v24  ;;  %v500_v22 = vmax.f32 %v484_v25, 0.0  ;;  %v768_v29 = vmul.f32 %v1393_v55, %v746_v21  ;;  %v735_v25 = vpop.permute.xlu0 %734 }
 0x146   :  { %v1053_v31 = vpop.eup %1052  ;;  %v508_v61 = vmax.f32 %v492_v49, 0.0  ;;  %v776_v54 = vmul.f32 %v1393_v55, %v754_v26  ;;  %353 = vst [vmem:[#allocation5 + $0x38] sm:$0xff] %v337_v27  ;;  %v653_v7 = vmul.f32 %v1464_v37, %v1411_v5  ;;  %v345_v11 = vmul.f32 %v1468_v40, %v1409_v3 }
 0x147   :  { %598 = vst [vmem:[#allocation5 + $0x98] sm:$0xff] %v581_v42  ;;  %v589_v32 = vmul.f32 %v1053_v31, %v1429_v4  ;;  %1060 = vpow2.f32 %v571_v28  ;;  %v516_v33 = vsub.f32 0.0, %v500_v22  ;;  %785 = vst [vmem:[#allocation5 + $0x120] sm:$0xff] %v768_v29  ;;  %v487_v60 = vsub.f32 %v1403_v62, %v471_v30 }
 0x148   :  { %v524_v34 = vsub.f32 0.0, %v508_v61  ;;  %793 = vst [vmem:[#allocation5 + $0x160] sm:$0xff] %v776_v54  ;;  %v749_v16 = vmul.f32 %v1407_v0, %v653_v7  ;;  %361 = vst [vmem:[#allocation5 + $0x78] sm:$0xff] %v345_v11  ;;  %v479_v35 = vmul.f32 2.0, %v1468_v40  ;;  %v661_v37 = vmul.f32 %v1468_v40, %v1411_v5 }
 0x149   :  { %606 = vst [vmem:[#allocation5 + $0xd8] sm:$0xff] %v589_v32  ;;  %v533_v58 = vmul.f32 %v1421_v10, %v516_v33  ;;  %v503_v39 = vmax.f32 %v487_v60, 0.0  ;;  %v336_v51 = vmul.f32 %v1409_v3, %v1470_v48  ;;  %v470_v62 = vmul.f32 2.0, %v1470_v48 }
 0x14a   :  { %v1055_v36 = vpop.eup %1054  ;;  %v541_v43 = vmul.f32 %v1421_v10, %v524_v34  ;;  %v771_v0 = vmul.f32 %v1393_v55, %v749_v16  ;;  %v495_v44 = vsub.f32 %v1425_v12, %v479_v35  ;;  %v757_v47 = vmul.f32 %v740_v38, %v661_v37 }
 0x14b   :  { %v580_v40 = vmul.f32 %v1055_v36, %v1429_v4  ;;  %v553_v50 = vmul.f32 1.442695, %v533_v58  ;;  %v519_v52 = vsub.f32 0.0, %v503_v39  ;;  %352 = vst [vmem:[#allocation5 + $0x30] sm:$0xff] %v336_v51  ;;  %v486_v6 = vsub.f32 %v1405_v63, %v470_v62 }
 0x14c   :  { %v1057_v17 = vpop.eup %1056  ;;  %v569_v53 = vmul.f32 1.442695, %v541_v43  ;;  %788 = vst [vmem:[#allocation5 + $0x138] sm:$0xff] %v771_v0  ;;  %v511_v57 = vmax.f32 %v495_v44, 0.0  ;;  %v779_v59 = vmul.f32 %v1393_v55, %v757_v47  ;;  %v652_v8 = vmul.f32 %v1411_v5, %v1470_v48 }
 0x14d   :  { %v1059_v46 = vpop.eup %1058  ;;  %597 = vst [vmem:[#allocation5 + $0x90] sm:$0xff] %v580_v40  ;;  %v588_v12 = vmul.f32 %v1057_v17, %v1429_v4  ;;  %1062 = vpow2.f32 %v553_v50  ;;  %v536_v1 = vmul.f32 %v1421_v10, %v519_v52  ;;  %v502_v14 = vmax.f32 %v486_v6, 0.0 }
 0x14e   :  { %v583_v15 = vmul.f32 %v1059_v46, %v1429_v4  ;;  %1064 = vpow2.f32 %v569_v53  ;;  %v527_v63 = vsub.f32 0.0, %v511_v57  ;;  %796 = vst [vmem:[#allocation5 + $0x178] sm:$0xff] %v779_v59  ;;  %v748_v18 = vmul.f32 %v1419_v9, %v652_v8 }
 0x14f   :  { %605 = vst [vmem:[#allocation5 + $0xd0] sm:$0xff] %v588_v12  ;;  %v559_v2 = vmul.f32 1.442695, %v536_v1  ;;  %v518_v41 = vsub.f32 0.0, %v502_v14  ;;  %v344_v48 = vmul.f32 %v1409_v3, %v1473_v45  ;;  %v478_v19 = vmul.f32 2.0, %v1473_v45 }
 0x150   :  { %600 = vst [vmem:[#allocation5 + $0xa8] sm:$0xff] %v583_v15  ;;  %v544_v20 = vmul.f32 %v1421_v10, %v527_v63  ;;  %v770_v23 = vmul.f32 %v1393_v55, %v748_v18  ;;  %v660_v56 = vmul.f32 %v1411_v5, %v1473_v45 }
 0x151   :  { %v1061_v24 = vpop.eup %1060  ;;  %1066 = vpow2.f32 %v559_v2  ;;  %v535_v9 = vmul.f32 %v1421_v10, %v518_v41  ;;  %360 = vst [vmem:[#allocation5 + $0x70] sm:$0xff] %v344_v48  ;;  %v494_v21 = vsub.f32 %v1427_v13, %v478_v19 }
 0x152   :  { %v591_v3 = vmul.f32 %v1061_v24, %v1429_v4  ;;  %v575_v42 = vmul.f32 1.442695, %v544_v20  ;;  %787 = vst [vmem:[#allocation5 + $0x130] sm:$0xff] %v770_v23  ;;  %v756_v49 = vmul.f32 %v735_v25, %v660_v56 }
 0x153   :  { %v557_v26 = vmul.f32 1.442695, %v535_v9  ;;  %v510_v27 = vmax.f32 %v494_v21, 0.0 }
 0x154   :  { %608 = vst [vmem:[#allocation5 + $0xe8] sm:$0xff] %v591_v3  ;;  %1068 = vpow2.f32 %v575_v42  ;;  %v778_v28 = vmul.f32 %v1393_v55, %v756_v49 }
 0x155   :  { %1070 = vpow2.f32 %v557_v26  ;;  %v526_v5 = vsub.f32 0.0, %v510_v27 }
 0x156   :  { %795 = vst [vmem:[#allocation5 + $0x170] sm:$0xff] %v778_v28 }
 0x157   :  { %v1063_v45 = vpop.eup %1062  ;;  %v543_v22 = vmul.f32 %v1421_v10, %v526_v5 }
 0x158   :  { %v1065_v29 = vpop.eup %1064  ;;  %v582_v13 = vmul.f32 %v1063_v45, %v1429_v4 }
 0x159   :  { %v590_v30 = vmul.f32 %v1065_v29, %v1429_v4  ;;  %v573_v31 = vmul.f32 1.442695, %v543_v22 }
 0x15a   :  { %599 = vst [vmem:[#allocation5 + $0xa0] sm:$0xff] %v582_v13 }
 0x15b   :  { %v1067_v61 = vpop.eup %1066  ;;  %607 = vst [vmem:[#allocation5 + $0xe0] sm:$0xff] %v590_v30  ;;  %1072 = vpow2.f32 %v573_v31 }
 0x15c   :  { %v585_v54 = vmul.f32 %v1067_v61, %v1429_v4 }
 0x15e   :  { %v1069_v7 = vpop.eup %1068  ;;  %602 = vst [vmem:[#allocation5 + $0xb8] sm:$0xff] %v585_v54 }
 0x15f   :  { %v1071_v55 = vpop.eup %1070  ;;  %v593_v11 = vmul.f32 %v1069_v7, %v1429_v4 }
 0x160   :  { %v584_v32 = vmul.f32 %v1071_v55, %v1429_v4 }
 0x161   :  { %610 = vst [vmem:[#allocation5 + $0xf8] sm:$0xff] %v593_v11 }
 0x162   :  { %601 = vst [vmem:[#allocation5 + $0xb0] sm:$0xff] %v584_v32 }
 0x165   :  { %v1073_v10 = vpop.eup %1072 }
 0x166   :  { %v592_v33 = vmul.f32 %v1073_v10, %v1429_v4 }
 0x168   :  { %609 = vst [vmem:[#allocation5 + $0xf0] sm:$0xff] %v592_v33 }
 0x169   :  { %1097 = shalt.err (!%p1094_p9)
}
 0x16a   :  { %s1098_s20 = scalar_lea.hbm %s1592_s5, 6144 }
 0x16b   :  { %p1099_p10 = scmp.ne.s32.totalorder %s1592_s5, %s1098_s20  ;;  %p1102_p11 = scmp.lt.u32.totalorder %s1098_s20, %s1592_s5 }
 0x16d   :  { %p1104_p12 = pnand %p1102_p11, %p1099_p10 }
 0x16f   :  { %1107 = shalt.err (!%p1104_p12)
}
 0x170   :  { %s1115_s25 = smov 128   ;;  %s1116_s26 = smov 8  }
 0x171   :  { %808 = dma.vmem_to_hbm [thread:$0]  %s803_s16, 6144, %s1592_s5, [#allocation3], %s1115_s25, %s1115_s25, %s1116_s26  }
 0x172   :  { %1110 = dma.done.wait [#allocation3], 6144  }
 0x173   :  { %1111 = vsyncadd [#allocation3], 4294961152 }
 0x174   :  { %812 = vsyncpa [#allocation3], 1 }
 0x175   :  { %813 = vsyncpa [#allocation4], 1 }

</bundles_post_ra>
